<compile_context>
chip_gen: v7x
topology: tpu7x:2x2x1
jax: 0.10.0
libtpu: 0.0.40
codegen_flags: <defaults>
</compile_context>

<pallas_src>
import jax
import jax.numpy as jnp
from jax.experimental import pallas as pl
from jax.experimental.pallas import tpu as pltpu

INPUT_DIM = 1404
HIDDEN = 64
OUTPUT_DIM = 4   # TODO(synk): env.action_space.n is runtime-dependent (gym env unavailable); fixed to 4.

H_PAD = 128      # hidden 64 -> 128 (lane-dense)
OUT_PAD = 128    # output 4 -> 128 (lane-dense store; real columns sliced in wrapper)


def _cdiv(a, b):
    return (a + b - 1) // b


def _round_up(n, m):
    return _cdiv(n, m) * m


def _qnet_kernel(x_ref, w1_ref, b1_ref, w2_ref, b2_ref, w3_ref, b3_ref, o_ref):
    # x tile: [TB, 1404] f32 straight from HBM; cast to bf16 on-chip for the MXU.
    x = x_ref[...].astype(jnp.bfloat16)
    h1 = jnp.dot(x, w1_ref[...], preferred_element_type=jnp.float32) + b1_ref[...]
    h1 = jnp.maximum(h1, 0.0).astype(jnp.bfloat16)            # relu(fc1)
    h2 = jnp.dot(h1, w2_ref[...], preferred_element_type=jnp.float32) + b2_ref[...]
    h2 = jnp.maximum(h2, 0.0).astype(jnp.bfloat16)            # relu(fc2)
    out = jnp.dot(h2, w3_ref[...], preferred_element_type=jnp.float32) + b3_ref[...]
    o_ref[...] = out.astype(o_ref.dtype)                      # fc3 (no activation), bf16 lane-dense store


def _pad2(a, rows, cols, dtype):
    return jnp.pad(a, ((0, rows - a.shape[0]), (0, cols - a.shape[1]))).astype(dtype)


def qnetwork_forward(x, params, block_b=1024):
    """x: [B, ...] float32 (flattened to [B, 1404]). params: (in,out) weights, (1,out) biases."""
    B = x.shape[0]
    x = x.reshape(B, -1)
    assert x.shape[1] == INPUT_DIM

    # Tile selection:
    #   * padding waste < 1 tile (TB derived from the tile count, not the other way around),
    #   * >= 2 grid steps when B >= 16 so "parallel" can shard across v7x's 2 TensorCores,
    #   * TB multiple of 8 sublanes; last tile may run past B (OOB rows are dropped).
    min_tiles = 2 if B >= 16 else 1
    n_tiles = max(_cdiv(B, block_b), min_tiles)
    TB = _round_up(_cdiv(B, n_tiles), 8)
    n_tiles = _cdiv(B, TB)
    Bp = n_tiles * TB   # rows actually streamed (for cost accounting only)

    # Pad + cast the (tiny) weights/biases once; x itself is never touched in the wrapper.
    w1p = _pad2(params["w1"], INPUT_DIM, H_PAD, jnp.bfloat16)   # (1404, 128): pad only the out dim
    b1p = _pad2(params["b1"], 1, H_PAD, jnp.float32)
    w2p = _pad2(params["w2"], H_PAD, H_PAD, jnp.bfloat16)
    b2p = _pad2(params["b2"], 1, H_PAD, jnp.float32)
    w3p = _pad2(params["w3"], H_PAD, OUT_PAD, jnp.bfloat16)
    b3p = _pad2(params["b3"], 1, OUT_PAD, jnp.float32)

    flops = 2 * Bp * (INPUT_DIM * H_PAD + H_PAD * H_PAD + H_PAD * OUT_PAD)
    bytes_accessed = (
        Bp * INPUT_DIM * 4                                           # x stream (f32, read exactly once)
        + (INPUT_DIM * H_PAD + H_PAD * H_PAD + H_PAD * OUT_PAD) * 2  # weights (bf16, resident)
        + 3 * H_PAD * 4                                              # biases (f32)
        + Bp * OUT_PAD * 2                                           # output writeback (bf16)
    )

    out = pl.pallas_call(
        _qnet_kernel,
        out_shape=jax.ShapeDtypeStruct((B, OUT_PAD), jnp.bfloat16),
        grid=(n_tiles,),
        in_specs=[
            pl.BlockSpec((TB, INPUT_DIM), lambda i: (i, 0)),      # x: streamed f32, full feature dim
            pl.BlockSpec((INPUT_DIM, H_PAD), lambda i: (0, 0)),   # w1: resident in VMEM
            pl.BlockSpec((1, H_PAD), lambda i: (0, 0)),           # b1
            pl.BlockSpec((H_PAD, H_PAD), lambda i: (0, 0)),       # w2
            pl.BlockSpec((1, H_PAD), lambda i: (0, 0)),           # b2
            pl.BlockSpec((H_PAD, OUT_PAD), lambda i: (0, 0)),     # w3
            pl.BlockSpec((1, OUT_PAD), lambda i: (0, 0)),         # b3
        ],
        out_specs=pl.BlockSpec((TB, OUT_PAD), lambda i: (i, 0)),
        compiler_params=pltpu.CompilerParams(
            dimension_semantics=("parallel",),
            vmem_limit_bytes=32 * 1024 * 1024,   # f32 x tile @ TB=1024, double-buffered, fits on v5e too
        ),
        cost_estimate=pl.CostEstimate(
            flops=flops, transcendentals=0, bytes_accessed=bytes_accessed),
    )(x, w1p, b1p, w2p, b2p, w3p, b3p)

    # Slice the real action columns; cast the bf16 Q-values back to f32 for the caller.
    return out[:, :OUTPUT_DIM].astype(jnp.float32)


def init_params(key):
    """Deterministic init mimicking nn.Linear default (U[-1/sqrt(fan_in), 1/sqrt(fan_in)]).
    Weights stored transposed as (in_features, out_features); biases as (1, out)."""
    def linear(k, fan_in, fan_out):
        kw, kb = jax.random.split(k)
        bound = 1.0 / jnp.sqrt(fan_in)
        w = jax.random.uniform(kw, (fan_in, fan_out), jnp.float32, -bound, bound)
        b = jax.random.uniform(kb, (1, fan_out), jnp.float32, -bound, bound)
        return w, b

    k1, k2, k3 = jax.random.split(key, 3)
    w1, b1 = linear(k1, INPUT_DIM, HIDDEN)
    w2, b2 = linear(k2, HIDDEN, HIDDEN)
    w3, b3 = linear(k3, HIDDEN, OUTPUT_DIM)
    return {"w1": w1, "b1": b1, "w2": w2, "b2": b2, "w3": w3, "b3": b3}


def reference_forward(x, p):
    """Pure-f32 reference (matches the PyTorch module's math)."""
    h1 = jnp.maximum(x @ p["w1"] + p["b1"], 0.0)
    h2 = jnp.maximum(h1 @ p["w2"] + p["b2"], 0.0)
    return h2 @ p["w3"] + p["b3"]


if __name__ == "__main__":
    key = jax.random.PRNGKey(0)
    kx, kx2, kp = jax.random.split(key, 3)
    params = init_params(kp)

    # Case 1: tiny batch (single partial tile, OOB rows dropped).
    B1 = 2
    x1 = jax.random.normal(kx, (B1, INPUT_DIM), jnp.float32)
    out1 = jax.block_until_ready(qnetwork_forward(x1, params))
    ref1 = reference_forward(x1, params)
    assert out1.shape == (B1, OUTPUT_DIM)
    assert out1.dtype == jnp.float32
    # bf16 MXU inputs + bf16 writeback with f32 accumulation -> looser tolerance than pure f32.
    assert jnp.allclose(out1, ref1, atol=3e-2, rtol=3e-2), \
        f"max abs err {float(jnp.max(jnp.abs(out1 - ref1)))}"

    # Case 2: multi-tile grid (B >= 16 -> 2 grid steps, last tile partial).
    B2 = 20
    x2 = jax.random.normal(kx2, (B2, INPUT_DIM), jnp.float32)
    out2 = jax.block_until_ready(qnetwork_forward(x2, params))
    ref2 = reference_forward(x2, params)
    assert out2.shape == (B2, OUTPUT_DIM)
    assert jnp.allclose(out2, ref2, atol=3e-2, rtol=3e-2), \
        f"max abs err {float(jnp.max(jnp.abs(out2 - ref2)))}"

    print("KERNEL_OK")
</pallas_src>

<mosaic_0001>
module attributes {stable_mosaic.version = 11 : i64} {
  func.func @_qnet_kernel(%arg0: i32, %arg1: memref<8x1404xf32, #tpu.memory_space<vmem>>, %arg2: memref<1404x128xbf16, #tpu.memory_space<vmem>>, %arg3: memref<1x128xf32, #tpu.memory_space<vmem>>, %arg4: memref<128x128xbf16, #tpu.memory_space<vmem>>, %arg5: memref<1x128xf32, #tpu.memory_space<vmem>>, %arg6: memref<128x128xbf16, #tpu.memory_space<vmem>>, %arg7: memref<1x128xf32, #tpu.memory_space<vmem>>, %arg8: memref<8x128xbf16, #tpu.memory_space<vmem>>) attributes {dimension_semantics = [#tpu.dimension_semantics<parallel>], iteration_bounds = array<i64: 1>, scalar_prefetch = 0 : i64, scratch_operands = 0 : i64, tpu.core_type = #tpu.core_type<tc>, window_params = [{transform_indices = @transform_0, window_bounds = array<i64: 8, 1404>}, {pipeline_mode = #tpu.pipeline_mode<synchronous>, transform_indices = @transform_1, window_bounds = array<i64: 1404, 128>}, {pipeline_mode = #tpu.pipeline_mode<synchronous>, transform_indices = @transform_2, window_bounds = array<i64: 1, 128>}, {pipeline_mode = #tpu.pipeline_mode<synchronous>, transform_indices = @transform_3, window_bounds = array<i64: 128, 128>}, {pipeline_mode = #tpu.pipeline_mode<synchronous>, transform_indices = @transform_4, window_bounds = array<i64: 1, 128>}, {pipeline_mode = #tpu.pipeline_mode<synchronous>, transform_indices = @transform_5, window_bounds = array<i64: 128, 128>}, {pipeline_mode = #tpu.pipeline_mode<synchronous>, transform_indices = @transform_6, window_bounds = array<i64: 1, 128>}, {transform_indices = @transform_7, window_bounds = array<i64: 8, 128>}]} {
    %c0 = arith.constant 0 : index
    %c0_0 = arith.constant 0 : index
    %0 = vector.load %arg1[%c0, %c0_0] : memref<8x1404xf32, #tpu.memory_space<vmem>>, vector<8x1404xf32>
    %1 = arith.truncf %0 : vector<8x1404xf32> to vector<8x1404xbf16>
    %c0_1 = arith.constant 0 : index
    %c0_2 = arith.constant 0 : index
    %2 = vector.load %arg2[%c0_1, %c0_2] : memref<1404x128xbf16, #tpu.memory_space<vmem>>, vector<1404x128xbf16>
    %cst = arith.constant dense<0.000000e+00> : vector<8x128xf32>
    %3 = tpu.matmul %1, %2, %cst {dimension_numbers = #tpu.dot_dimension_numbers<[1], [0], [0], [1], [0, 0, 1, 1], [], []>} : vector<8x1404xbf16>, vector<1404x128xbf16>, vector<8x128xf32> -> vector<8x128xf32>
    %c0_3 = arith.constant 0 : index
    %c0_4 = arith.constant 0 : index
    %4 = vector.load %arg3[%c0_3, %c0_4] : memref<1x128xf32, #tpu.memory_space<vmem>>, vector<1x128xf32>
    %5 = vector.broadcast %4 : vector<1x128xf32> to vector<8x128xf32>
    %6 = arith.addf %3, %5 : vector<8x128xf32>
    %cst_5 = arith.constant 0.000000e+00 : f32
    %7 = vector.broadcast %cst_5 : f32 to vector<8x128xf32>
    %8 = arith.maximumf %6, %7 : vector<8x128xf32>
    %9 = arith.truncf %8 : vector<8x128xf32> to vector<8x128xbf16>
    %c0_6 = arith.constant 0 : index
    %c0_7 = arith.constant 0 : index
    %10 = vector.load %arg4[%c0_6, %c0_7] : memref<128x128xbf16, #tpu.memory_space<vmem>>, vector<128x128xbf16>
    %cst_8 = arith.constant dense<0.000000e+00> : vector<8x128xf32>
    %11 = tpu.matmul %9, %10, %cst_8 {dimension_numbers = #tpu.dot_dimension_numbers<[1], [0], [0], [1], [0, 0, 1, 1], [], []>} : vector<8x128xbf16>, vector<128x128xbf16>, vector<8x128xf32> -> vector<8x128xf32>
    %c0_9 = arith.constant 0 : index
    %c0_10 = arith.constant 0 : index
    %12 = vector.load %arg5[%c0_9, %c0_10] : memref<1x128xf32, #tpu.memory_space<vmem>>, vector<1x128xf32>
    %13 = vector.broadcast %12 : vector<1x128xf32> to vector<8x128xf32>
    %14 = arith.addf %11, %13 : vector<8x128xf32>
    %cst_11 = arith.constant 0.000000e+00 : f32
    %15 = vector.broadcast %cst_11 : f32 to vector<8x128xf32>
    %16 = arith.maximumf %14, %15 : vector<8x128xf32>
    %17 = arith.truncf %16 : vector<8x128xf32> to vector<8x128xbf16>
    %c0_12 = arith.constant 0 : index
    %c0_13 = arith.constant 0 : index
    %18 = vector.load %arg6[%c0_12, %c0_13] : memref<128x128xbf16, #tpu.memory_space<vmem>>, vector<128x128xbf16>
    %cst_14 = arith.constant dense<0.000000e+00> : vector<8x128xf32>
    %19 = tpu.matmul %17, %18, %cst_14 {dimension_numbers = #tpu.dot_dimension_numbers<[1], [0], [0], [1], [0, 0, 1, 1], [], []>} : vector<8x128xbf16>, vector<128x128xbf16>, vector<8x128xf32> -> vector<8x128xf32>
    %c0_15 = arith.constant 0 : index
    %c0_16 = arith.constant 0 : index
    %20 = vector.load %arg7[%c0_15, %c0_16] : memref<1x128xf32, #tpu.memory_space<vmem>>, vector<1x128xf32>
    %21 = vector.broadcast %20 : vector<1x128xf32> to vector<8x128xf32>
    %22 = arith.addf %19, %21 : vector<8x128xf32>
    %23 = arith.truncf %22 : vector<8x128xf32> to vector<8x128xbf16>
    %c0_17 = arith.constant 0 : index
    %c0_18 = arith.constant 0 : index
    %24 = vector.load %arg8[%c0_17, %c0_18] : memref<8x128xbf16, #tpu.memory_space<vmem>>, vector<8x128xbf16>
    tpu.vector_store %arg8[%c0_17, %c0_18], %23 {strides = array<i32>} : memref<8x128xbf16, #tpu.memory_space<vmem>>, vector<8x128xbf16>,
    return
  }
  func.func @transform_0(%arg0: i32) -> (i32, i32) {
    %c0_i32 = arith.constant 0 : i32
    %c0_i32_0 = arith.constant 0 : i32
    return %arg0, %c0_i32 : i32, i32
  }
  func.func @transform_1(%arg0: i32) -> (i32, i32) {
    %c0_i32 = arith.constant 0 : i32
    %c0_i32_0 = arith.constant 0 : i32
    %c0_i32_1 = arith.constant 0 : i32
    return %c0_i32, %c0_i32_0 : i32, i32
  }
  func.func @transform_2(%arg0: i32) -> (i32, i32) {
    %c0_i32 = arith.constant 0 : i32
    %c0_i32_0 = arith.constant 0 : i32
    %c0_i32_1 = arith.constant 0 : i32
    return %c0_i32, %c0_i32_0 : i32, i32
  }
  func.func @transform_3(%arg0: i32) -> (i32, i32) {
    %c0_i32 = arith.constant 0 : i32
    %c0_i32_0 = arith.constant 0 : i32
    %c0_i32_1 = arith.constant 0 : i32
    return %c0_i32, %c0_i32_0 : i32, i32
  }
  func.func @transform_4(%arg0: i32) -> (i32, i32) {
    %c0_i32 = arith.constant 0 : i32
    %c0_i32_0 = arith.constant 0 : i32
    %c0_i32_1 = arith.constant 0 : i32
    return %c0_i32, %c0_i32_0 : i32, i32
  }
  func.func @transform_5(%arg0: i32) -> (i32, i32) {
    %c0_i32 = arith.constant 0 : i32
    %c0_i32_0 = arith.constant 0 : i32
    %c0_i32_1 = arith.constant 0 : i32
    return %c0_i32, %c0_i32_0 : i32, i32
  }
  func.func @transform_6(%arg0: i32) -> (i32, i32) {
    %c0_i32 = arith.constant 0 : i32
    %c0_i32_0 = arith.constant 0 : i32
    %c0_i32_1 = arith.constant 0 : i32
    return %c0_i32, %c0_i32_0 : i32, i32
  }
  func.func @transform_7(%arg0: i32) -> (i32, i32) {
    %c0_i32 = arith.constant 0 : i32
    %c0_i32_0 = arith.constant 0 : i32
    return %arg0, %c0_i32 : i32, i32
  }
}

</mosaic_0001>

<bundles_post_ra>
// kernel: tpu_custom_call.1
= control target key start
LH: loop header
LB: loop body
LE: loop exit
PB: predicated region body
PF: predicated region fallthrough
CT: control target
= control target key end

     0   :  { %12 = vsyncpa [#allocation3], 0  ;;  %s2224_s0 = inlined_call_operand.hbm [shape: f32[2,1404], index: 0, kind: input, shape index: {}]   ;;  %s2225_s1 = inlined_call_operand.hbm [shape: bf16[1404,128], index: 1, kind: input, shape index: {}]   ;;  %s2226_s2 = inlined_call_operand.vmem [shape: f32[1,128], index: 2, kind: input, shape index: {}]   ;;  %s2227_s3 = inlined_call_operand.hbm [shape: bf16[128,128], index: 3, kind: input, shape index: {}]   ;;  %s2228_s4 = inlined_call_operand.vmem [shape: f32[1,128], index: 4, kind: input, shape index: {}]   ;;  %s2229_s5 = inlined_call_operand.hbm [shape: bf16[128,128], index: 5, kind: input, shape index: {}]   ;;  %s2230_s6 = inlined_call_operand.vmem [shape: f32[1,128], index: 6, kind: input, shape index: {}]   ;;  %s2231_s7 = inlined_call_operand.hbm [shape: bf16[2,128], index: 7, kind: output, shape index: {}]  }
   0x1   :  { %13 = vsyncpa [#allocation6], 0 }
   0x2   :  { %14 = vsyncpa [#allocation9], 0 }
   0x3   :  { %15 = vsyncpa [#allocation4], 0 }
   0x4   :  { %20 = vsyncadd [#allocation3], 1056  ;;  %s2035_s24 = smov [#allocation5]   ;;  %s1917_s28 = scalar_lea.hbm %s2225_s1, 11264 }
   0x5   :  { %s33_s25 = sshll.u32 %s2035_s24, 4  ;;  %p1918_p0 = scmp.ne.s32.totalorder %s2225_s1, %s1917_s28  ;;  %s34_s25 = int_to_ptr.vmem [resolvable:$true] %s33_s25 }
   0x6   :  { %p1921_p1 = scmp.lt.u32.totalorder %s1917_s28, %s2225_s1 }
   0x8   :  { %p1923_p2 = pnand %p1921_p1, %p1918_p0 }
   0xa   :  { %1926 = shalt.err (!%p1923_p2)
}
   0xb   :  { %s1927_s10 = scalar_lea.vmem %s34_s25, 11264  ;;  %p1932_p4 = scmp.lt.s32.totalorder %s34_s25, %s34_s25 }
   0xc   :  { %p1928_p3 = scmp.ne.s32.totalorder %s34_s25, %s1927_s10  ;;  %p1933_p5 = scmp.lt.s32.totalorder %s1927_s10, %s1927_s10 }
   0xe   :  { %p1934_p6 = por %p1933_p5, %p1932_p4 }
  0x10   :  { %p1935_p7 = pnand %p1934_p6, %p1928_p3 }
  0x12   :  { %1938 = shalt.err (!%p1935_p7)
}
  0x13   :  { %s2036_s11 = smov 64   ;;  %s2037_s12 = smov 4  }
  0x14   :  { %39 = dma.hbm_to_vmem [thread:$0]  %s2225_s1, 11264, %s34_s25, [#allocation6], %s2036_s11, %s2036_s11, %s2037_s12  }
  0x15   :  { %s2038_s15 = smov [#allocation2]   ;;  %s1939_s19 = scalar_lea.hbm %s2224_s0, 352 }
  0x16   :  { %s21_s16 = sshll.u32 %s2038_s15, 4  ;;  %p1940_p8 = scmp.ne.s32.totalorder %s2224_s0, %s1939_s19  ;;  %s22_s16 = int_to_ptr.vmem [resolvable:$true] %s21_s16 }
  0x17   :  { %p1943_p9 = scmp.lt.u32.totalorder %s1939_s19, %s2224_s0 }
  0x19   :  { %p1945_p10 = pnand %p1943_p9, %p1940_p8 }
  0x1b   :  { %1948 = shalt.err (!%p1945_p10)
}
  0x1c   :  { %s1949_s24 = scalar_lea.vmem %s22_s16, 352  ;;  %s1953_s1 = scalar_lea.vmem %s22_s16, 1408 }
  0x1d   :  { %p1950_p11 = scmp.ne.s32.totalorder %s22_s16, %s1949_s24  ;;  %p1954_p12 = scmp.lt.s32.totalorder %s22_s16, %s22_s16 }
  0x1e   :  { %p1955_p13 = scmp.lt.s32.totalorder %s1953_s1, %s1949_s24 }
  0x20   :  { %p1956_p0 = por %p1955_p13, %p1954_p12 }
  0x22   :  { %p1957_p1 = pnand %p1956_p0, %p1950_p11 }
  0x24   :  { %1960 = shalt.err (!%p1957_p1)
}
  0x25   :  { %s2039_s25 = smov 352   ;;  %s2040_s26 = smov 22  }
  0x26   :  { %27 = dma.hbm_to_vmem [thread:$0]  %s2224_s0, 352, %s22_s16, [#allocation3], %s2039_s25, %s2039_s25, %s2040_s26  }
  0x27   :  { %s2041_s29 = smov [#allocation7]   ;;  %s2042_s8 = smov [#allocation8]  }
  0x28   :  { %s47_s30 = sshll.u32 %s2041_s29, 4  ;;  %s61_s9 = sshll.u32 %s2042_s8, 4  ;;  %s48_s30 = int_to_ptr.vmem [resolvable:$true] %s47_s30  ;;  %s2117_s9 = int_to_ptr.vmem [resolvable:$true] %s61_s9 }
  0x29   :  { %s1961_s14 = scalar_lea.hbm %s2227_s3, 1024 }
  0x2a   :  { %p1962_p2 = scmp.ne.s32.totalorder %s2227_s3, %s1961_s14  ;;  %p1965_p3 = scmp.lt.u32.totalorder %s1961_s14, %s2227_s3 }
  0x2c   :  { %p1967_p4 = pnand %p1965_p3, %p1962_p2 }
  0x2e   :  { %1970 = shalt.err (!%p1967_p4)
}
  0x2f   :  { %s1971_s0 = scalar_lea.vmem %s48_s30, 1024  ;;  %p1976_p6 = scmp.lt.s32.totalorder %s48_s30, %s48_s30 }
  0x30   :  { %p1972_p5 = scmp.ne.s32.totalorder %s48_s30, %s1971_s0  ;;  %p1977_p7 = scmp.lt.s32.totalorder %s1971_s0, %s1971_s0 }
  0x32   :  { %p1978_p8 = por %p1977_p7, %p1976_p6 }
  0x34   :  { %p1979_p9 = pnand %p1978_p8, %p1972_p5 }
  0x36   :  { %1982 = shalt.err (!%p1979_p9)
}
  0x37   :  { %53 = dma.hbm_to_vmem [thread:$0]  %s2227_s3, 1024, %s48_s30, [#allocation6], %s2036_s11, %s2036_s11, %s2037_s12  }
  0x38   :  { %s1983_s23 = scalar_lea.hbm %s2229_s5, 1024 }
  0x39   :  { %p1984_p10 = scmp.ne.s32.totalorder %s2229_s5, %s1983_s23  ;;  %p1987_p11 = scmp.lt.u32.totalorder %s1983_s23, %s2229_s5 }
  0x3b   :  { %p1989_p12 = pnand %p1987_p11, %p1984_p10 }
  0x3d   :  { %1992 = shalt.err (!%p1989_p12)
}
  0x3e   :  { %s1993_s27 = scalar_lea.vmem %s2117_s9, 1024  ;;  %p1998_p0 = scmp.lt.s32.totalorder %s2117_s9, %s2117_s9 }
  0x3f   :  { %p1994_p13 = scmp.ne.s32.totalorder %s2117_s9, %s1993_s27  ;;  %p1999_p1 = scmp.lt.s32.totalorder %s1993_s27, %s1993_s27 }
  0x41   :  { %p2000_p2 = por %p1999_p1, %p1998_p0 }
  0x43   :  { %p2001_p3 = pnand %p2000_p2, %p1994_p13 }
  0x45   :  { %2004 = shalt.err (!%p2001_p3)
}
  0x46   :  { %67 = dma.hbm_to_vmem [thread:$0]  %s2229_s5, 1024, %s2117_s9, [#allocation9], %s2036_s11, %s2036_s11, %s2037_s12  }
  0x47   :  { %2027 = dma.done.wait [#allocation3], 1408  }
  0x48   :  { %2028 = vsyncadd [#allocation3], 4294965888 }
  0x49   :  { %2029 = dma.done.wait [#allocation6], 12288  }
  0x4a   :  { %2030 = vsyncadd [#allocation6], 4294955008 }
  0x4b   :  { %2031 = dma.done.wait [#allocation9], 1024  }
  0x4c   :  { %2032 = vsyncadd [#allocation9], 4294966272  ;;  %v1795_v0 = vld [vmem:[#allocation5 + $0x40] sm:$0xff]   ;;  %v1799_v4 = vld [vmem:[#allocation5 + $0x48] sm:$0xff]   ;;  %v2043_v23 = vmov 1983009808   ;;  %v114_v25 = vlaneseq }
  0x4d   :  { %v1796_v1 = vld [vmem:[#allocation5] sm:$0xff]   ;;  %1583 = vmatprep.subr.bf16.mxu0 %v1795_v0  ;;  %v1800_v5 = vld [vmem:[#allocation5 + $0x8] sm:$0xff]   ;;  %v1803_v8 = vld [vmem:[#allocation5 + $0x50] sm:$0xff]   ;;  %v112_v24 = vunpack.c.l.s4 %v2043_v23  ;;  %vm2045_vm0 = vmmov 0   ;;  %vm950_vm1 = vcmask 1045504   ;;  %vm946_vm2 = vcmask 1014784  }
  0x4e   :  { %v1797_v2 = vld [vmem:[#allocation5 + $0xc0] sm:$0xff]   ;;  %1584 = vmatpush3.bf16.msra.mxu0 %v1796_v1  ;;  %v1801_v6 = vld [vmem:[#allocation5 + $0xc8] sm:$0xff]   ;;  %v1804_v9 = vld [vmem:[#allocation5 + $0x10] sm:$0xff]   ;;  %v2154_v31 = vshrl.u32 %v114_v25, 7 }
  0x4f   :  { %v1798_v3 = vld [vmem:[#allocation5 + $0x80] sm:$0xff]   ;;  %1605 = vmatprep.subr.bf16.mxu1 %v1797_v2  ;;  %1585 = vmatprep.subr.bf16.mxu0 %v1799_v4  ;;  %v1802_v7 = vld [vmem:[#allocation5 + $0x88] sm:$0xff]   ;;  %v1805_v10 = vld [vmem:[#allocation5 + $0xd0] sm:$0xff]   ;;  %v113_v30 = vunpack.c.0.s8 %v112_v24 }
  0x50   :  { %1606 = vmatpush3.bf16.msra.mxu1 %v1798_v3  ;;  %v1806_v11 = vld [vmem:[#allocation5 + $0x90] sm:$0xff]   ;;  %v1807_v12 = vld [vmem:[#allocation5 + $0x58] sm:$0xff]   ;;  %v1811_v16 = vld [vmem:[#allocation5 + $0x60] sm:$0xff]  }
  0x51   :  { %1607 = vmatprep.subr.bf16.mxu1 %v1801_v6  ;;  %v1808_v13 = vld [vmem:[#allocation5 + $0x18] sm:$0xff]   ;;  %v1812_v17 = vld [vmem:[#allocation5 + $0x20] sm:$0xff]   ;;  %v1815_v20 = vld [vmem:[#allocation5 + $0x68] sm:$0xff]   ;;  %v2157_v36 = vsub.s32 %v113_v30, %v2154_v31 }
  0x52   :  { %1586 = vmatpush3.bf16.msra.mxu0 %v1800_v5  ;;  %v1809_v14 = vld [vmem:[#allocation5 + $0xd8] sm:$0xff]   ;;  %v1813_v18 = vld [vmem:[#allocation5 + $0xe0] sm:$0xff]   ;;  %v1816_v21 = vld [vmem:[#allocation5 + $0x28] sm:$0xff]  }
  0x53   :  { %1587 = vmatprep.subr.bf16.mxu0 %v1803_v8  ;;  %v1810_v15 = vld [vmem:[#allocation5 + $0x98] sm:$0xff]   ;;  %v1814_v19 = vld [vmem:[#allocation5 + $0xa0] sm:$0xff]   ;;  %v1817_v22 = vld [vmem:[#allocation5 + $0xe8] sm:$0xff]  }
  0x54   :  { %1608 = vmatpush3.bf16.msra.mxu1 %v1802_v7  ;;  %v1818_v26 = vld [vmem:[#allocation5 + $0xa8] sm:$0xff]   ;;  %v1819_v27 = vld [vmem:[#allocation5 + $0x70] sm:$0xff]   ;;  %v1823_v33 = vld [vmem:[#allocation5 + $0x78] sm:$0xff]  }
  0x55   :  { %1609 = vmatprep.subr.bf16.mxu1 %v1805_v10  ;;  %v1820_v28 = vld [vmem:[#allocation5 + $0x30] sm:$0xff]   ;;  %v1824_v34 = vld [vmem:[#allocation5 + $0x38] sm:$0xff]   ;;  %v1831_v42 = vld [vmem:[#allocation5 + $0x140] sm:$0xff]  }
  0x56   :  { %1588 = vmatpush3.bf16.msra.mxu0 %v1804_v9  ;;  %v1821_v29 = vld [vmem:[#allocation5 + $0xf0] sm:$0xff]   ;;  %v1825_v35 = vld [vmem:[#allocation5 + $0xf8] sm:$0xff]   ;;  %v1832_v43 = vld [vmem:[#allocation2 + $0x4] ss:$22 sps:$4 sm:$0xff]  }
  0x57   :  { %1589 = vmatprep.subr.bf16.mxu0 %v1807_v12  ;;  %v1822_v32 = vld [vmem:[#allocation5 + $0xb0] sm:$0xff]   ;;  %v1826_v37 = vld [vmem:[#allocation2] ss:$22 sps:$4 sm:$0xff]   ;;  %v124_v47 = vrot.slane %v1832_v43, %v2157_v36 }
  0x58   :  { %1610 = vmatpush3.bf16.msra.mxu1 %v1806_v11  ;;  %v1828_v38 = vld [vmem:[#allocation2 + $0x2c] ss:$22 sps:$4 sm:$0xff]   ;;  %v1830_v39 = vld [vmem:[#allocation5 + $0xb8] sm:$0xff]   ;;  %v117_v40 = vrot.slane %v1826_v37, %v2157_v36  ;;  %v1835_v49 = vld [vmem:[#allocation5 + $0x1c0] sm:$0xff]  }
  0x59   :  { %1611 = vmatprep.subr.bf16.mxu1 %v1809_v14  ;;  %v131_v41 = vrot.slane %v1828_v38, %v2157_v36  ;;  %v1833_v44 = vld [vmem:[#allocation2 + $0x30] ss:$22 sps:$4 sm:$0xff]   ;;  %v1834_v52 = vld [vmem:[#allocation5 + $0x100] sm:$0xff]  }
  0x5a   :  { %1590 = vmatpush3.bf16.msra.mxu0 %v1808_v13  ;;  %v138_v48 = vrot.slane %v1833_v44, %v2157_v36  ;;  %v1837_v55 = vld [vmem:[#allocation5 + $0x148] sm:$0xff]   ;;  %v1836_v56 = vld [vmem:[#allocation5 + $0x180] sm:$0xff]   ;;  %v1841_v61 = vld [vmem:[#allocation5 + $0x150] sm:$0xff]  }
  0x5b   :  { %1591 = vmatprep.subr.bf16.mxu0 %v1811_v16  ;;  %v140_v45 = vcombine.high %v117_v40, %v131_v41  ;;  %v139_v46 = vcombine.low %v117_v40, %v131_v41  ;;  %v1838_v59 = vld [vmem:[#allocation5 + $0x108] sm:$0xff]   ;;  %v1842_v63 = vld [vmem:[#allocation5 + $0x110] sm:$0xff]   ;;  %v1845_v1 = vld [vmem:[#allocation5 + $0x158] sm:$0xff]   ;;  %v2044_v40 = vmov 0.0  }
  0x5c   :  { %1612 = vmatpush3.bf16.msra.mxu1 %v1810_v15  ;;  %v142_v53 = vcombine.high %v124_v47, %v138_v48  ;;  %v141_v54 = vcombine.low %v124_v47, %v138_v48  ;;  %v1839_v60 = vld [vmem:[#allocation5 + $0x1c8] sm:$0xff]   ;;  %v1843_v0 = vld [vmem:[#allocation5 + $0x1d0] sm:$0xff]   ;;  %v1846_v3 = vld [vmem:[#allocation5 + $0x118] sm:$0xff]  }
  0x5d   :  { %1613 = vmatprep.subr.bf16.mxu1 %v1813_v18  ;;  %v226_v50 = vpack.c.bf16 %v140_v45, %v140_v45  ;;  %v225_v51 = vpack.c.bf16 %v139_v46, %v139_v46  ;;  %v1840_v62 = vld [vmem:[#allocation5 + $0x188] sm:$0xff]   ;;  %v1844_v2 = vld [vmem:[#allocation5 + $0x190] sm:$0xff]   ;;  %v1847_v4 = vld [vmem:[#allocation5 + $0x1d8] sm:$0xff]  }
  0x5e   :  { %1592 = vmatpush3.bf16.msra.mxu0 %v1812_v17  ;;  %v228_v57 = vpack.c.bf16 %v142_v53, %v142_v53  ;;  %v227_v58 = vpack.c.bf16 %v141_v54, %v141_v54  ;;  %v1849_v5 = vld [vmem:[#allocation5 + $0x160] sm:$0xff]   ;;  %v1848_v6 = vld [vmem:[#allocation5 + $0x198] sm:$0xff]   ;;  %v1853_v9 = vld [vmem:[#allocation5 + $0x168] sm:$0xff]  }
  0x5f   :  { %1593 = vmatprep.subr.bf16.mxu0 %v1815_v20  ;;  %986 = vmatprep.mubr.bf16.mxu0 %v226_v50  ;;  %v1850_v7 = vld [vmem:[#allocation5 + $0x120] sm:$0xff]   ;;  %v1854_v11 = vld [vmem:[#allocation5 + $0x128] sm:$0xff]   ;;  %v1857_v13 = vld [vmem:[#allocation5 + $0x170] sm:$0xff]  }
  0x60   :  { %1614 = vmatpush3.bf16.msra.mxu1 %v1814_v19  ;;  %1026 = vmatprep.mubr.bf16.mxu1 %v228_v57  ;;  %v1851_v8 = vld [vmem:[#allocation5 + $0x1e0] sm:$0xff]   ;;  %v1855_v12 = vld [vmem:[#allocation5 + $0x1e8] sm:$0xff]   ;;  %v1858_v15 = vld [vmem:[#allocation5 + $0x130] sm:$0xff]  }
  0x61   :  { %1615 = vmatprep.subr.bf16.mxu1 %v1817_v22  ;;  %v1852_v10 = vld [vmem:[#allocation5 + $0x1a0] sm:$0xff]   ;;  %v1856_v14 = vld [vmem:[#allocation5 + $0x1a8] sm:$0xff]   ;;  %v1859_v16 = vld [vmem:[#allocation5 + $0x1f0] sm:$0xff]  }
  0x62   :  { %1594 = vmatpush3.bf16.msra.mxu0 %v1816_v21  ;;  %v1860_v17 = vld [vmem:[#allocation5 + $0x1b0] sm:$0xff]   ;;  %v1861_v18 = vld [vmem:[#allocation5 + $0x178] sm:$0xff]   ;;  %v1872_v37 = vld [vmem:[#allocation5 + $0x200] sm:$0xff]  }
  0x63   :  { %1595 = vmatprep.subr.bf16.mxu0 %v1819_v27  ;;  %v1862_v19 = vld [vmem:[#allocation5 + $0x138] sm:$0xff]   ;;  %v1864_v21 = vld [vmem:[#allocation2 + $0x8] ss:$22 sps:$4 sm:$0xff]   ;;  %v1870_v27 = vld [vmem:[#allocation2 + $0xc] ss:$22 sps:$4 sm:$0xff]  }
  0x64   :  { %1616 = vmatpush3.bf16.msra.mxu1 %v1818_v26  ;;  %v1863_v20 = vld [vmem:[#allocation5 + $0x1f8] sm:$0xff]   ;;  %v153_v24 = vrot.slane %v1864_v21, %v2157_v36  ;;  %v1869_v26 = vld [vmem:[#allocation5 + $0x240] sm:$0xff]   ;;  %v1874_v41 = vld [vmem:[#allocation5 + $0x248] sm:$0xff]  }
  0x65   :  { %1617 = vmatprep.subr.bf16.mxu1 %v1821_v29  ;;  %v1866_v22 = vld [vmem:[#allocation2 + $0x34] ss:$22 sps:$4 sm:$0xff]   ;;  %v1873_v44 = vld [vmem:[#allocation5 + $0x280] sm:$0xff]   ;;  %v1875_v45 = vld [vmem:[#allocation5 + $0x208] sm:$0xff]  }
  0x66   :  { %1596 = vmatpush3.bf16.msra.mxu0 %v1820_v28  ;;  %v1868_v23 = vld [vmem:[#allocation5 + $0x1b8] sm:$0xff]   ;;  %v167_v25 = vrot.slane %v1866_v22, %v2157_v36  ;;  %v1877_v46 = vld [vmem:[#allocation5 + $0x250] sm:$0xff]   ;;  %v1876_v47 = vld [vmem:[#allocation5 + $0x288] sm:$0xff]  }
  0x67   :  { %1597 = vmatprep.subr.bf16.mxu0 %v1823_v33  ;;  %v1871_v28 = vld [vmem:[#allocation2 + $0x38] ss:$22 sps:$4 sm:$0xff]   ;;  %v1887_v57 = vld [vmem:[#allocation5 + $0x228] sm:$0xff]  }
  0x68   :  { %1618 = vmatpush3.bf16.msra.mxu1 %v1822_v32  ;;  %v176_v29 = vcombine.high %v153_v24, %v167_v25  ;;  %v175_v30 = vcombine.low %v153_v24, %v167_v25  ;;  %v160_v32 = vrot.slane %v1870_v27, %v2157_v36  ;;  %v174_v33 = vrot.slane %v1871_v28, %v2157_v36  ;;  %v1878_v48 = vld [vmem:[#allocation5 + $0x210] sm:$0xff]   ;;  %v1882_v53 = vld [vmem:[#allocation5 + $0x298] sm:$0xff]   ;;  %v1884_v54 = vld [vmem:[#allocation5 + $0x220] sm:$0xff]  }
  0x69   :  { %1619 = vmatprep.subr.bf16.mxu1 %v1825_v35  ;;  %v1879_v50 = vld [vmem:[#allocation5 + $0x290] sm:$0xff]   ;;  %v1908_v22 = vld [vmem:[#allocation7 + $0x38] sm:$0xff]   ;;  %v1910_v24 = vld [vmem:[#allocation8 + $0x8] sm:$0xff]  }
  0x6a   :  { %1598 = vmatpush3.bf16.msra.mxu0 %v1824_v34  ;;  %v230_v34 = vpack.c.bf16 %v176_v29, %v176_v29  ;;  %v229_v35 = vpack.c.bf16 %v175_v30, %v175_v30  ;;  %v178_v38 = vcombine.high %v160_v32, %v174_v33  ;;  %v1907_v21 = vld [vmem:[#allocation7 + $0x30] sm:$0xff]   ;;  %v1913_v27 = vld [vmem:[#allocation8 + $0x20] sm:$0xff]   ;;  %v1914_v28 = vld [vmem:[#allocation8 + $0x28] sm:$0xff]  }
  0x6b   :  { %1627 = vmatprep.subr.bf16.mxu0 %v1831_v42  ;;  %v1911_v25 = vld [vmem:[#allocation8 + $0x10] sm:$0xff]   ;;  %v1473_v30 = vld [vmem:[%s2226_s2] ss:$0 sm:$0xff] }
  0x6c   :  { %1620 = vmatpush3.bf16.msra.mxu1 %v1830_v39  ;;  %v177_v39 = vcombine.low %v160_v32, %v174_v33  ;;  %v232_v42 = vpack.c.bf16 %v178_v38, %v178_v38 }
  0x6d   :  { %1649 = vmatprep.subr.bf16.mxu1 %v1835_v49  ;;  %987 = vmatmul.mubr.bf16.vlgmr.msra.gmra.mrb[0].mxu0 %v225_v51  ;;  %v1880_v49 = vld [vmem:[#allocation5 + $0x258] sm:$0xff]  }
  0x6e   :  { %1628 = vmatpush3.bf16.msra.mxu0 %v1834_v52  ;;  %1066 = vmatprep.mubr.bf16.mxu0 %v230_v34  ;;  %v231_v43 = vpack.c.bf16 %v177_v39, %v177_v39  ;;  %v1881_v51 = vld [vmem:[#allocation5 + $0x218] sm:$0xff]   ;;  %v1883_v52 = vld [vmem:[#allocation5 + $0x260] sm:$0xff]  }
  0x6f   :  { %1629 = vmatprep.subr.bf16.mxu0 %v1837_v55  ;;  %1027 = vmatmul.mubr.bf16.vlgmr.msra.gmra.mrb[0].mxu1 %v227_v58  ;;  %v1886_v55 = vld [vmem:[#allocation5 + $0x268] sm:$0xff]  }
  0x70   :  { %1650 = vmatpush3.bf16.msra.mxu1 %v1836_v56  ;;  %1106 = vmatprep.mubr.bf16.mxu1 %v232_v42  ;;  %v1885_v56 = vld [vmem:[#allocation5 + $0x2a0] sm:$0xff]   ;;  %v1894_v58 = vld [vmem:[#allocation2 + $0x10] ss:$22 sps:$4 sm:$0xff]  }
  0x71   :  { %1651 = vmatprep.subr.bf16.mxu1 %v1839_v60  ;;  %v1889_v60 = vld [vmem:[#allocation5 + $0x270] sm:$0xff]  }
  0x72   :  { %1630 = vmatpush3.bf16.msra.mxu0 %v1838_v59  ;;  %v1888_v59 = vld [vmem:[#allocation5 + $0x2a8] sm:$0xff]  }
  0x73   :  { %1631 = vmatprep.subr.bf16.mxu0 %v1841_v61  ;;  %v1896_v61 = vld [vmem:[#allocation2 + $0x14] ss:$22 sps:$4 sm:$0x33]  }
  0x74   :  { %1652 = vmatpush3.bf16.msra.mxu1 %v1840_v62  ;;  %v1897_v62 = vld [vmem:[#allocation2 + $0x3c] ss:$22 sps:$4 sm:$0xff]  }
  0x75   :  { %1653 = vmatprep.subr.bf16.mxu1 %v1843_v0  ;;  %v1899_v0 = vld [vmem:[#allocation2 + $0x40] ss:$22 sps:$4 sm:$0x33]  }
  0x76   :  { %1632 = vmatpush3.bf16.msra.mxu0 %v1842_v63  ;;  %v1890_v63 = vld [vmem:[#allocation5 + $0x230] sm:$0xff]  }
  0x77   :  { %1633 = vmatprep.subr.bf16.mxu0 %v1845_v1  ;;  %v189_v1 = vrot.slane %v1894_v58, %v2157_v36 }
  0x78   :  { %1654 = vmatpush3.bf16.msra.mxu1 %v1844_v2  ;;  %v203_v2 = vrot.slane %v1897_v62, %v2157_v36 }
  0x79   :  { %1655 = vmatprep.subr.bf16.mxu1 %v1847_v4  ;;  %v1891_v4 = vld [vmem:[#allocation5 + $0x2b0] sm:$0xff]  }
  0x7a   :  { %1634 = vmatpush3.bf16.msra.mxu0 %v1846_v3  ;;  %v1900_v3 = vld [vmem:[#allocation5 + $0x2b8] sm:$0x3f]  }
  0x7b   :  { %1635 = vmatprep.subr.bf16.mxu0 %v1849_v5  ;;  %v1892_v5 = vld [vmem:[#allocation5 + $0x278] sm:$0xff]  }
  0x7c   :  { %1656 = vmatpush3.bf16.msra.mxu1 %v1848_v6  ;;  %v212_v6 = vcombine.high %v189_v1, %v203_v2 }
  0x7d   :  { %1657 = vmatprep.subr.bf16.mxu1 %v1851_v8  ;;  %v1893_v8 = vld [vmem:[#allocation5 + $0x238] sm:$0xff]  }
  0x7e   :  { %1636 = vmatpush3.bf16.msra.mxu0 %v1850_v7  ;;  %v952_v7 = vsel %vm950_vm1, %v1900_v3, 0 }
  0x7f   :  { %1637 = vmatprep.subr.bf16.mxu0 %v1853_v9  ;;  %v196_v9 = vrot.slane %v1896_v61, %v2157_v36 }
  0x80   :  { %1658 = vmatpush3.bf16.msra.mxu1 %v1852_v10  ;;  %v210_v10 = vrot.slane %v1899_v0, %v2157_v36  ;;  %v1901_v36 = vld [vmem:[#allocation7] sm:$0xff]  }
  0x81   :  { %1659 = vmatprep.subr.bf16.mxu1 %v1855_v12  ;;  %v211_v12 = vcombine.low %v189_v1, %v203_v2 }
  0x82   :  { %1638 = vmatpush3.bf16.msra.mxu0 %v1854_v11  ;;  %v234_v11 = vpack.c.bf16 %v212_v6, %v212_v6  ;;  %v1915_v6 = vld [vmem:[#allocation8 + $0x30] sm:$0xff]  }
  0x83   :  { %1639 = vmatprep.subr.bf16.mxu0 %v1857_v13  ;;  %v213_v13 = vcombine.low %v196_v9, %v210_v10 }
  0x84   :  { %1660 = vmatpush3.bf16.msra.mxu1 %v1856_v14  ;;  %v233_v14 = vpack.c.bf16 %v211_v12, %v211_v12 }
  0x85   :  { %1661 = vmatprep.subr.bf16.mxu1 %v1859_v16  ;;  %v1902_v16 = vld [vmem:[#allocation7 + $0x8] sm:$0xff]  }
  0x86   :  { %1640 = vmatpush3.bf16.msra.mxu0 %v1858_v15  ;;  %v235_v15 = vpack.c.bf16 %v213_v13, %v213_v13 }
  0x87   :  { %1641 = vmatprep.subr.bf16.mxu0 %v1861_v18  ;;  %v1904_v18 = vld [vmem:[#allocation7 + $0x18] sm:$0xff]  }
  0x88   :  { %1662 = vmatpush3.bf16.msra.mxu1 %v1860_v17  ;;  %v1903_v17 = vld [vmem:[#allocation7 + $0x10] sm:$0xff]  }
  0x89   :  { %1663 = vmatprep.subr.bf16.mxu1 %v1863_v20  ;;  %v1906_v20 = vld [vmem:[#allocation7 + $0x28] sm:$0xff]  }
  0x8a   :  { %1642 = vmatpush3.bf16.msra.mxu0 %v1862_v19  ;;  %v1905_v19 = vld [vmem:[#allocation7 + $0x20] sm:$0xff]  }
  0x8b   :  { %1671 = vmatprep.subr.bf16.mxu0 %v1869_v26  ;;  %v1912_v26 = vld [vmem:[#allocation8 + $0x18] sm:$0xff]  }
  0x8c   :  { %1664 = vmatpush3.bf16.msra.mxu1 %v1868_v23  ;;  %v1909_v23 = vld [vmem:[#allocation8] sm:$0xff]  }
  0x8d   :  { %1720 = vmatprep.subr.bf16.mxu1 %v2044_v40  ;;  %1067 = vmatmul.mubr.bf16.vlgmr.msra.gmra.mrb[4].mxu0 %v229_v35 }
  0x8e   :  { %1672 = vmatpush3.bf16.msra.mxu0 %v1872_v37  ;;  %1146 = vmatprep.mubr.bf16.mxu0 %v234_v11 }
  0x8f   :  { %1673 = vmatprep.subr.bf16.mxu0 %v1874_v41  ;;  %1107 = vmatmul.mubr.bf16.vlgmr.msra.gmra.mrb[4].mxu1 %v231_v43 }
  0x90   :  { %1721 = vmatpush3.bf16.msra.mxu1 %v1873_v44  ;;  %1736 = vmatprep.mubr.msk.bf16.mxu1 %vm2045_vm0, %v2044_v40 }
  0x91   :  { %1722 = vmatprep.subr.bf16.mxu1 %v2044_v40 }
  0x92   :  { %1674 = vmatpush3.bf16.msra.mxu0 %v1875_v45 }
  0x93   :  { %1675 = vmatprep.subr.bf16.mxu0 %v1877_v46 }
  0x94   :  { %1723 = vmatpush3.bf16.msra.mxu1 %v1876_v47 }
  0x95   :  { %1724 = vmatprep.subr.bf16.mxu1 %v2044_v40 }
  0x96   :  { %1676 = vmatpush3.bf16.msra.mxu0 %v1878_v48 }
  0x97   :  { %1677 = vmatprep.subr.bf16.mxu0 %v1880_v49 }
  0x98   :  { %1725 = vmatpush3.bf16.msra.mxu1 %v1879_v50 }
  0x99   :  { %1726 = vmatprep.subr.bf16.mxu1 %v2044_v40 }
  0x9a   :  { %1678 = vmatpush3.bf16.msra.mxu0 %v1881_v51 }
  0x9b   :  { %1679 = vmatprep.subr.bf16.mxu0 %v1883_v52 }
  0x9c   :  { %1727 = vmatpush3.bf16.msra.mxu1 %v1882_v53 }
  0x9d   :  { %1728 = vmatprep.subr.bf16.mxu1 %v2044_v40 }
  0x9e   :  { %1680 = vmatpush3.bf16.msra.mxu0 %v1884_v54 }
  0x9f   :  { %1681 = vmatprep.subr.bf16.mxu0 %v1886_v55 }
  0xa0   :  { %1729 = vmatpush3.bf16.msra.mxu1 %v1885_v56 }
  0xa1   :  { %1730 = vmatprep.subr.bf16.mxu1 %v2044_v40 }
  0xa2   :  { %1682 = vmatpush3.bf16.msra.mxu0 %v1887_v57 }
  0xa3   :  { %1683 = vmatprep.subr.bf16.mxu0 %v1889_v60 }
  0xa4   :  { %1731 = vmatpush3.bf16.msra.mxu1 %v1888_v59 }
  0xa5   :  { %1732 = vmatprep.subr.bf16.mxu1 %v2044_v40 }
  0xa6   :  { %1684 = vmatpush3.bf16.msra.mxu0 %v1890_v63 }
  0xa7   :  { %1685 = vmatprep.subr.bf16.mxu0 %v1892_v5 }
  0xa8   :  { %1733 = vmatpush3.bf16.msra.mxu1 %v1891_v4 }
  0xa9   :  { %1734 = vmatprep.subr.bf16.mxu1 %v2044_v40 }
  0xaa   :  { %1686 = vmatpush3.bf16.msra.mxu0 %v1893_v8  ;;  %v1563_v8 = vld [vmem:[%s2228_s4] ss:$0 sm:$0xff] }
  0xab   :  { %1740 = vmatprep.subr.bf16.mxu0 %v2044_v40 }
  0xac   :  { %1735 = vmatpush3.bf16.msra.mxu1 %v952_v7  ;;  %v1916_v7 = vld [vmem:[#allocation8 + $0x38] sm:$0xff]  }
  0xad   :  { %1147 = vmatmul.mubr.bf16.vlgmr.msra.gmra.mrb[8].mxu0 %v233_v14  ;;  %1760 = vmatprep.subr.bf16.mxu1 %v2044_v40 }
  0xae   :  { %1756 = vmatprep.mubr.msk.bf16.mxu0 %vm2045_vm0, %v2044_v40  ;;  %1741 = vmatpush3.bf16.msra.mxu0 %v1901_v36  ;;  %v2046_v36 = vmov 1966171168  }
  0xaf   :  { %1737 = vmatmul.mubr.msk.bf16.vlgmr.msra.gmra.mrb[8].mxu1 %vm946_vm2, %v235_v15  ;;  %1742 = vmatprep.subr.bf16.mxu0 %v2044_v40 }
  0xb0   :  { %1776 = vmatprep.mubr.msk.bf16.mxu1 %vm2045_vm0, %v2044_v40  ;;  %1761 = vmatpush3.bf16.msra.mxu1 %v1909_v23 }
  0xb1   :  { %1762 = vmatprep.subr.bf16.mxu1 %v2044_v40 }
  0xb2   :  { %1743 = vmatpush3.bf16.msra.mxu0 %v1902_v16  ;;  %v1423_v16 = vunpack.c.l.s4 %v2046_v36 }
  0xb3   :  { %1744 = vmatprep.subr.bf16.mxu0 %v2044_v40 }
  0xb4   :  { %1763 = vmatpush3.bf16.msra.mxu1 %v1910_v24 }
  0xb5   :  { %1764 = vmatprep.subr.bf16.mxu1 %v2044_v40 }
  0xb6   :  { %1745 = vmatpush3.bf16.msra.mxu0 %v1903_v17  ;;  %v1424_v17 = vunpack.c.0.s8 %v1423_v16 }
  0xb7   :  { %1746 = vmatprep.subr.bf16.mxu0 %v2044_v40 }
  0xb8   :  { %1765 = vmatpush3.bf16.msra.mxu1 %v1911_v25 }
  0xb9   :  { %1766 = vmatprep.subr.bf16.mxu1 %v2044_v40 }
  0xba   :  { %1747 = vmatpush3.bf16.msra.mxu0 %v1904_v18 }
  0xbb   :  { %1748 = vmatprep.subr.bf16.mxu0 %v2044_v40 }
  0xbc   :  { %1767 = vmatpush3.bf16.msra.mxu1 %v1912_v26 }
  0xbd   :  { %1768 = vmatprep.subr.bf16.mxu1 %v2044_v40 }
  0xbe   :  { %1749 = vmatpush3.bf16.msra.mxu0 %v1905_v19 }
  0xbf   :  { %1750 = vmatprep.subr.bf16.mxu0 %v2044_v40 }
  0xc0   :  { %1769 = vmatpush3.bf16.msra.mxu1 %v1913_v27 }
  0xc1   :  { %1770 = vmatprep.subr.bf16.mxu1 %v2044_v40 }
  0xc2   :  { %1751 = vmatpush3.bf16.msra.mxu0 %v1906_v20  ;;  %v1427_v20 = vsub.s32 %v1424_v17, %v2154_v31 }
  0xc3   :  { %1752 = vmatprep.subr.bf16.mxu0 %v2044_v40 }
  0xc4   :  { %1771 = vmatpush3.bf16.msra.mxu1 %v1914_v28 }
  0xc5   :  { %1772 = vmatprep.subr.bf16.mxu1 %v2044_v40 }
  0xc6   :  { %1753 = vmatpush3.bf16.msra.mxu0 %v1907_v21 }
  0xc7   :  { %1754 = vmatprep.subr.bf16.mxu0 %v2044_v40 }
  0xc8   :  { %1773 = vmatpush3.bf16.msra.mxu1 %v1915_v6 }
  0xc9   :  { %1774 = vmatprep.subr.bf16.mxu1 %v2044_v40  ;;  %v1572_v40 = vld [vmem:[%s2230_s6] ss:$0 sm:$0xff] }
  0xca   :  { %1755 = vmatpush3.bf16.msra.mxu0 %v1908_v22 }
  0xcc   :  { %1775 = vmatpush3.bf16.msra.mxu1 %v1916_v7 }
 0x140   :  { %v1599_v29 = vpop.f32.mrb[0].mxu0 }
 0x141   :  { %v1600_v32 = vpop.f32.mrb[1].mxu0 }
 0x142   :  { %v1601_v33 = vadd.f32 %v1600_v32, %v1599_v29  ;;  %v1602_v34 = vpop.f32.mrb[2].mxu0  ;;  %v1621_v35 = vpop.f32.mrb[0].mxu1 }
 0x143   :  { %v1603_v37 = vpop.f32.mrb[3].mxu0  ;;  %v1622_v39 = vpop.f32.mrb[1].mxu1 }
 0x144   :  { %v989_v38 = vadd.f32 %v1601_v33, %v1473_v30  ;;  %v1623_v41 = vadd.f32 %v1622_v39, %v1621_v35  ;;  %v1624_v42 = vpop.f32.mrb[2].mxu1 }
 0x145   :  { %v1625_v43 = vpop.f32.mrb[3].mxu1 }
 0x146   :  { %v1029_v44 = vadd.f32 %v1623_v41, %v989_v38 }
 0x160   :  { %v1643_v45 = vpop.f32.mrb[4].mxu0 }
 0x161   :  { %v1644_v46 = vpop.f32.mrb[5].mxu0 }
 0x162   :  { %v1645_v47 = vadd.f32 %v1644_v46, %v1643_v45  ;;  %v1646_v48 = vpop.f32.mrb[6].mxu0  ;;  %v1665_v49 = vpop.f32.mrb[4].mxu1 }
 0x163   :  { %v1647_v50 = vpop.f32.mrb[7].mxu0  ;;  %v1666_v52 = vpop.f32.mrb[5].mxu1 }
 0x164   :  { %v1069_v51 = vadd.f32 %v1645_v47, %v1029_v44  ;;  %v1667_v53 = vadd.f32 %v1666_v52, %v1665_v49  ;;  %v1668_v54 = vpop.f32.mrb[6].mxu1 }
 0x165   :  { %v1669_v55 = vpop.f32.mrb[7].mxu1 }
 0x166   :  { %v1109_v56 = vadd.f32 %v1667_v53, %v1069_v51 }
 0x180   :  { %v1687_v57 = vpop.f32.mrb[8].mxu0 }
 0x181   :  { %v1688_v58 = vpop.f32.mrb[9].mxu0 }
 0x182   :  { %v1689_v59 = vadd.f32 %v1688_v58, %v1687_v57  ;;  %v1690_v60 = vpop.f32.mrb[10].mxu0  ;;  %v1188_v61 = vpop.f32.mrb[8].mxu1 }
 0x183   :  { %v1691_v62 = vpop.f32.mrb[11].mxu0  ;;  %v1738_v0 = vpop.f32.mrb[9].mxu1 }
 0x184   :  { %v1149_v63 = vadd.f32 %v1689_v59, %v1109_v56  ;;  %v1191_v1 = vpop.f32.mrb[10].mxu1 }
 0x185   :  { %v1739_v3 = vpop.f32.mrb[11].mxu1 }
 0x186   :  { %v1189_v2 = vadd.f32 %v1188_v61, %v1149_v63 }
 0x188   :  { %v1194_v4 = vmax.f32 %v1189_v2, 0.0 }
 0x18a   :  { %v1195_v5 = vpack.c.bf16 %v1194_v4, %v1194_v4 }
 0x18c   :  { %1757 = vmatmul.mubr.bf16.vlgmr.msra.gmra.mrb[12].mxu0 %v1195_v5 }
 0x25f   :  { %v1301_v9 = vpop.f32.mrb[12].mxu0 }
 0x260   :  { %v1302_v10 = vadd.f32 %v1563_v8, %v1301_v9  ;;  %v1758_v11 = vpop.f32.mrb[13].mxu0 }
 0x261   :  { %v1304_v12 = vpop.f32.mrb[14].mxu0 }
 0x262   :  { %v1307_v13 = vmax.f32 %v1302_v10, 0.0  ;;  %v1759_v14 = vpop.f32.mrb[15].mxu0 }
 0x264   :  { %v1308_v15 = vpack.c.bf16 %v1307_v13, %v1307_v13 }
 0x266   :  { %1777 = vmatmul.mubr.bf16.vlgmr.msra.gmra.mrb[12].mxu1 %v1308_v15 }
 0x339   :  { %v1414_v18 = vpop.f32.mrb[12].mxu1 }
 0x33a   :  { %v1415_v19 = vadd.f32 %v1572_v40, %v1414_v18  ;;  %v1778_v21 = vpop.f32.mrb[13].mxu1 }
 0x33b   :  { %v1417_v22 = vpop.f32.mrb[14].mxu1 }
 0x33c   :  { %v1420_v23 = vpack.c.bf16 %v1415_v19, %v1415_v19  ;;  %v1779_v24 = vpop.f32.mrb[15].mxu1 }
 0x33e   :  { %v1428_v25 = vrot.slane %v1420_v23, %v1427_v20 }
 0x340   :  { %v1429_v26 = vcombine.high %v1428_v25, %v1428_v25  ;;  %v1436_v27 = vrot.slane %v1428_v25, %v1427_v20  ;;  %1581 = vst.sshfl [vmem:[#allocation10] sm:$0x1 pattern:$0x73625140] %v1428_v25 }
 0x342   :  { %v1443_v28 = vrot.slane %v1429_v26, %v1427_v20  ;;  %v1444_v29 = vcombine.high %v1436_v27, %v1436_v27  ;;  %1582 = vst.sshfl [vmem:[#allocation10 + $0x1] sm:$0x1 pattern:$0x73625140] %v1429_v26 }
 0x344   :  { %v1445_v30 = vcombine.high %v1443_v28, %v1443_v28  ;;  %1452 = vst [vmem:[#allocation10 + $0x2] sm:$0x1] %v1444_v29 }
 0x346   :  { %1453 = vst [vmem:[#allocation10 + $0x3] sm:$0x1] %v1445_v30 }
 0x347   :  { %1458 = vsyncadd [#allocation4], 48  ;;  %s2047_s4 = smov [#allocation10]  }
 0x348   :  { %s1459_s6 = sshll.u32 %s2047_s4, 4  ;;  %s1460_s6 = int_to_ptr.vmem [resolvable:$true] %s1459_s6 }
 0x349   :  { %s2005_s8 = scalar_lea.vmem %s1460_s6, 16  ;;  %s2009_s9 = scalar_lea.vmem %s1460_s6, 64 }
 0x34a   :  { %p2006_p4 = scmp.ne.s32.totalorder %s1460_s6, %s2005_s8  ;;  %p2010_p5 = scmp.lt.s32.totalorder %s1460_s6, %s1460_s6 }
 0x34b   :  { %p2011_p6 = scmp.lt.s32.totalorder %s2009_s9, %s2005_s8 }
 0x34d   :  { %p2012_p7 = por %p2011_p6, %p2010_p5 }
 0x34f   :  { %p2013_p8 = pnand %p2012_p7, %p2006_p4 }
 0x351   :  { %2016 = shalt.err (!%p2013_p8)
}
 0x352   :  { %s2017_s14 = scalar_lea.hbm %s2231_s7, 16 }
 0x353   :  { %p2018_p9 = scmp.ne.s32.totalorder %s2231_s7, %s2017_s14  ;;  %p2021_p10 = scmp.lt.u32.totalorder %s2017_s14, %s2231_s7 }
 0x355   :  { %p2023_p11 = pnand %p2021_p10, %p2018_p9 }
 0x357   :  { %2026 = shalt.err (!%p2023_p11)
}
 0x358   :  { %s2048_s0 = smov 16   ;;  %s2049_s16 = smov 1  }
 0x359   :  { %1465 = dma.vmem_to_hbm [thread:$0]  %s1460_s6, 16, %s2231_s7, [#allocation4], %s2048_s0, %s2048_s0, %s2049_s16  }
 0x35a   :  { %2033 = dma.done.wait [#allocation4], 64  }
 0x35b   :  { %2034 = vsyncadd [#allocation4], 4294967232 }
 0x35c   :  { %1469 = vsyncpa [#allocation3], 1 }
 0x35d   :  { %1470 = vsyncpa [#allocation6], 1 }
 0x35e   :  { %1471 = vsyncpa [#allocation9], 1 }
 0x35f   :  { %1472 = vsyncpa [#allocation4], 1 }

</bundles_post_ra>
